<compile_context>
chip_gen: v7x
topology: tpu7x:2x2x1
jax: 0.10.0
libtpu: 0.0.40
codegen_flags: <defaults>
</compile_context>

<pallas_src>
import functools

import jax
import jax.numpy as jnp
from jax.experimental import pallas as pl
from jax.experimental.pallas import tpu as pltpu

COLOR_HIDDEN = 512


def _round_up(n, m):
    return ((n + m - 1) // m) * m


def _act(x, activation):
    if activation == "ReLU":
        return jnp.maximum(x, 0.0)
    elif activation == "gelu":
        # nn.GELU() default is the exact (erf) formulation.
        return jax.nn.gelu(x, approximate=False)
    raise ValueError(f"unsupported activation: {activation}")


# ----------------------------------------------------------------------------
# Single fused kernel: all four heads, all layers, one lane-dense output slab.
# Compact operands only (no structural-zero 640-wide slab).
# ----------------------------------------------------------------------------
def fused_heads_kernel(x_ref, w1s_ref, b1s_ref, w1c_ref, b1c_ref,
                       w2s_ref, b2s_ref, w2c_ref, b2c_ref,
                       w3c_ref, b3c_ref, wos_ref, woc_ref, bo_ref,
                       o_ref, *, activation):
    cdt = w1s_ref.dtype                       # bf16 compute dtype for MXU inputs
    x = x_ref[...].astype(cdt)                # [TB, l1]

    # Layer 1: two compact dots (avoid forming a fused 256-wide h1 slab).
    h1s = _act(jnp.dot(x, w1s_ref[...], preferred_element_type=jnp.float32)
               + b1s_ref[...], activation)    # [TB, 3*l2]  (small heads)
    h1c = _act(jnp.dot(x, w1c_ref[...], preferred_element_type=jnp.float32)
               + b1c_ref[...], activation)    # [TB, l2]    (color head)

    # Layer 2: compact block-diagonal (small heads) + compact (color).
    h2s = _act(jnp.dot(h1s.astype(cdt), w2s_ref[...],
                       preferred_element_type=jnp.float32) + b2s_ref[...],
               activation)                    # [TB, 128]   (cols 96:128 are pad)
    h2c = _act(jnp.dot(h1c.astype(cdt), w2c_ref[...],
                       preferred_element_type=jnp.float32) + b2c_ref[...],
               activation)                    # [TB, 512]

    # Color layer 3.
    c3 = _act(jnp.dot(h2c.astype(cdt), w3c_ref[...],
                      preferred_element_type=jnp.float32) + b3c_ref[...],
              activation)                     # [TB, l3]

    # Output layer: two block projections summed into one lane-dense [TB, 128] slab
    # (gender | master | subcat | color logits at cols 0:5 | 5:12 | 12:28 | 28:40).
    out = (jnp.dot(h2s.astype(cdt), wos_ref[...], preferred_element_type=jnp.float32)
           + jnp.dot(c3.astype(cdt), woc_ref[...], preferred_element_type=jnp.float32)
           + bo_ref[...])
    o_ref[...] = out.astype(o_ref.dtype)


# ----------------------------------------------------------------------------
# Parameter construction (deterministic, PyTorch-style uniform(+-1/sqrt(fan_in)))
# ----------------------------------------------------------------------------
def _make_linear(key, in_f, out_f):
    kw, kb = jax.random.split(key)
    bound = 1.0 / jnp.sqrt(float(in_f))
    # Stored pre-transposed: [in_f, out_f].
    w = jax.random.uniform(kw, (in_f, out_f), jnp.float32, -bound, bound)
    b = jax.random.uniform(kb, (1, out_f), jnp.float32, -bound, bound)
    return w, b


def init_params(key, hparams):
    l1, l2, l3 = hparams["layer1"], hparams["layer2"], hparams["layer3"]
    dims = {
        "gender": [(l1, l2), (l2, l3), (l3, hparams["gender_classes"])],
        "mastercat": [(l1, l2), (l2, l3), (l3, hparams["mastercat_classes"])],
        "subcat": [(l1, l2), (l2, l3), (l3, hparams["subcat_classes"])],
        "color": [(l1, l2), (l2, COLOR_HIDDEN), (COLOR_HIDDEN, l3),
                  (l3, hparams["color_classes"])],
    }
    params = {}
    for head, layer_dims in dims.items():
        ps = []
        for (i, o) in layer_dims:
            key, sub = jax.random.split(key)
            w, b = _make_linear(sub, i, o)
            ps += [w, b]
        params[head] = ps
    return params


# ----------------------------------------------------------------------------
# One-time packing (run ONCE at setup; never in the per-call forward path).
# Weights -> bf16; biases stay f32.
# ----------------------------------------------------------------------------
def pack_params(params, hparams, weight_dtype=jnp.bfloat16):
    l1, l2, l3 = hparams["layer1"], hparams["layer2"], hparams["layer3"]
    g, m, s, c = (params["gender"], params["mastercat"],
                  params["subcat"], params["color"])

    nc = [hparams["gender_classes"], hparams["mastercat_classes"],
          hparams["subcat_classes"], hparams["color_classes"]]
    offs = [0, nc[0], nc[0] + nc[1], nc[0] + nc[1] + nc[2]]
    out_pad = _round_up(sum(nc), 128)
    small_pad = _round_up(3 * l3, 128)

    # Layer 1: small heads fused along N; color head separate.
    w1s = jnp.concatenate([g[0], m[0], s[0]], axis=1)          # [l1, 3*l2]
    b1s = jnp.concatenate([g[1], m[1], s[1]], axis=1)          # [1, 3*l2]
    w1c, b1c = c[0], c[1]                                      # [l1, l2], [1, l2]

    # Layer 2: compact block-diagonal for the 3 small heads (padded to 128 cols).
    w2s = jnp.zeros((3 * l2, small_pad), jnp.float32)
    w2s = w2s.at[0 * l2:1 * l2, 0 * l3:1 * l3].set(g[2])
    w2s = w2s.at[1 * l2:2 * l2, 1 * l3:2 * l3].set(m[2])
    w2s = w2s.at[2 * l2:3 * l2, 2 * l3:3 * l3].set(s[2])
    b2s = jnp.zeros((1, small_pad), jnp.float32)
    b2s = b2s.at[:, 0 * l3:1 * l3].set(g[3])
    b2s = b2s.at[:, 1 * l3:2 * l3].set(m[3])
    b2s = b2s.at[:, 2 * l3:3 * l3].set(s[3])
    w2c, b2c = c[2], c[3]                                      # [l2, 512], [1, 512]

    # Color layer 3.
    w3c, b3c = c[4], c[5]                                      # [512, l3], [1, l3]

    # Output layer: block projections into one lane-dense slab of width out_pad.
    wos = jnp.zeros((small_pad, out_pad), jnp.float32)
    wos = wos.at[0 * l3:1 * l3, offs[0]:offs[0] + nc[0]].set(g[4])
    wos = wos.at[1 * l3:2 * l3, offs[1]:offs[1] + nc[1]].set(m[4])
    wos = wos.at[2 * l3:3 * l3, offs[2]:offs[2] + nc[2]].set(s[4])
    woc = jnp.zeros((l3, out_pad), jnp.float32)
    woc = woc.at[:, offs[3]:offs[3] + nc[3]].set(c[6])
    bo = jnp.zeros((1, out_pad), jnp.float32)
    bo = bo.at[:, offs[0]:offs[0] + nc[0]].set(g[5])
    bo = bo.at[:, offs[1]:offs[1] + nc[1]].set(m[5])
    bo = bo.at[:, offs[2]:offs[2] + nc[2]].set(s[5])
    bo = bo.at[:, offs[3]:offs[3] + nc[3]].set(c[7])

    wd = weight_dtype
    packed = tuple(jax.device_put(a) for a in (
        w1s.astype(wd), b1s, w1c.astype(wd), b1c,
        w2s.astype(wd), b2s, w2c.astype(wd), b2c,
        w3c.astype(wd), b3c,
        wos.astype(wd), woc.astype(wd), bo))
    meta = {"small_pad": small_pad, "out_pad": out_pad, "offs": offs, "nc": nc}
    return packed, meta


# ----------------------------------------------------------------------------
# Forward factory: closes over the pre-packed weights (no per-call packing).
# ----------------------------------------------------------------------------
def make_forward(packed, meta, hparams):
    activation = hparams["activation"]
    l1, l2, l3 = hparams["layer1"], hparams["layer2"], hparams["layer3"]
    out_pad, small_pad = meta["out_pad"], meta["small_pad"]
    offs, nc = meta["offs"], meta["nc"]
    kernel = functools.partial(fused_heads_kernel, activation=activation)
    vmem = pltpu.MemorySpace.VMEM

    def forward(x):
        b = x.shape[0]
        tb = min(128, _round_up(b, 8))          # batch tile (sublane-aligned)
        b_pad = _round_up(b, tb)
        x_p = jnp.pad(x, ((0, b_pad - b), (0, 0))) if b_pad != b else x
        grid = (b_pad // tb,)

        x_spec = pl.BlockSpec((tb, l1), lambda i: (i, 0), memory_space=vmem)
        w_specs = [pl.BlockSpec(p.shape, lambda i: (0, 0), memory_space=vmem)
                   for p in packed]             # constant index_map -> VMEM-resident
        out_spec = pl.BlockSpec((tb, out_pad), lambda i: (i, 0), memory_space=vmem)
        out_shape = jax.ShapeDtypeStruct((b_pad, out_pad), jnp.float32)

        flops_row = 2 * (l1 * 3 * l2 + l1 * l2 + 3 * l2 * small_pad
                         + l2 * COLOR_HIDDEN + COLOR_HIDDEN * l3
                         + small_pad * out_pad + l3 * out_pad)
        transc = 0 if activation == "ReLU" else b_pad * (4 * l2 + small_pad
                                                         + COLOR_HIDDEN + l3)
        bytes_acc = (x_p.size * x_p.dtype.itemsize
                     + sum(int(p.size) * p.dtype.itemsize for p in packed)
                     + b_pad * out_pad * 4)

        out = pl.pallas_call(
            kernel,
            grid=grid,
            in_specs=[x_spec] + w_specs,
            out_specs=out_spec,
            out_shape=out_shape,
            compiler_params=pltpu.CompilerParams(
                dimension_semantics=("parallel",)),
            cost_estimate=pl.CostEstimate(
                flops=flops_row * b_pad,
                transcendentals=transc,
                bytes_accessed=int(bytes_acc)),
        )(x_p, *packed)

        gender = out[:b, offs[0]:offs[0] + nc[0]]
        master = out[:b, offs[1]:offs[1] + nc[1]]
        subcat = out[:b, offs[2]:offs[2] + nc[2]]
        color = out[:b, offs[3]:offs[3] + nc[3]]
        return gender, master, subcat, color

    return jax.jit(forward)


# Pure-JAX reference (per-head, unpacked f32 weights) for validation.
def _ref_forward(x, params, hparams):
    def act(v):
        return _act(v, hparams["activation"])

    def head(ps):
        h = x
        n_layers = len(ps) // 2
        for i in range(n_layers - 1):
            h = act(h @ ps[2 * i] + ps[2 * i + 1])
        return h @ ps[-2] + ps[-1]

    return (head(params["gender"]), head(params["mastercat"]),
            head(params["subcat"]), head(params["color"]))


if __name__ == "__main__":
    hparams = {
        "layer1": 32,
        "layer2": 64,
        "layer3": 32,
        "gender_classes": 5,
        "mastercat_classes": 7,
        "subcat_classes": 16,
        "color_classes": 12,
        "activation": "ReLU",
        "dropout_val": 0.1,   # identity at inference
    }

    key = jax.random.PRNGKey(0)
    key, kx, kp = jax.random.split(key, 3)
    params = init_params(kp, hparams)

    # One-time setup (hoisted out of the forward path, per perf review).
    packed, meta = pack_params(params, hparams, weight_dtype=jnp.bfloat16)
    packed = jax.block_until_ready(packed)
    forward = make_forward(packed, meta, hparams)

    names = ("gender", "master", "subcat", "color")
    for batch in (8, 200):   # small batch + a padded / multi-tile batch case
        kx, sub = jax.random.split(kx)
        x = jax.random.normal(sub, (batch, hparams["layer1"]), jnp.float32)

        outs = jax.block_until_ready(forward(x))
        refs = _ref_forward(x, params, hparams)
        for name, o, r in zip(names, outs, refs):
            assert o.shape == r.shape, (name, o.shape, r.shape)
            # bf16 weights + f32 accumulation -> loosened tolerance.
            err = float(jnp.max(jnp.abs(o - r)))
            assert jnp.allclose(o, r, atol=5e-2, rtol=5e-2), \
                f"{name} mismatch (batch={batch}, max abs err {err:.4f})"

    print("KERNEL_OK")
</pallas_src>

<mosaic_0001>
module attributes {stable_mosaic.version = 11 : i64} {
  func.func @fused_heads_kernel(%arg0: i32, %arg1: memref<8x32xf32, #tpu.memory_space<vmem>>, %arg2: memref<32x192xbf16, #tpu.memory_space<vmem>>, %arg3: memref<1x192xf32, #tpu.memory_space<vmem>>, %arg4: memref<32x64xbf16, #tpu.memory_space<vmem>>, %arg5: memref<1x64xf32, #tpu.memory_space<vmem>>, %arg6: memref<192x128xbf16, #tpu.memory_space<vmem>>, %arg7: memref<1x128xf32, #tpu.memory_space<vmem>>, %arg8: memref<64x512xbf16, #tpu.memory_space<vmem>>, %arg9: memref<1x512xf32, #tpu.memory_space<vmem>>, %arg10: memref<512x32xbf16, #tpu.memory_space<vmem>>, %arg11: memref<1x32xf32, #tpu.memory_space<vmem>>, %arg12: memref<128x128xbf16, #tpu.memory_space<vmem>>, %arg13: memref<32x128xbf16, #tpu.memory_space<vmem>>, %arg14: memref<1x128xf32, #tpu.memory_space<vmem>>, %arg15: memref<8x128xf32, #tpu.memory_space<vmem>>) attributes {dimension_semantics = [#tpu.dimension_semantics<parallel>], iteration_bounds = array<i64: 1>, scalar_prefetch = 0 : i64, scratch_operands = 0 : i64, tpu.core_type = #tpu.core_type<tc>, window_params = [{transform_indices = @transform_0, window_bounds = array<i64: 8, 32>}, {pipeline_mode = #tpu.pipeline_mode<synchronous>, transform_indices = @transform_1, window_bounds = array<i64: 32, 192>}, {pipeline_mode = #tpu.pipeline_mode<synchronous>, transform_indices = @transform_2, window_bounds = array<i64: 1, 192>}, {pipeline_mode = #tpu.pipeline_mode<synchronous>, transform_indices = @transform_3, window_bounds = array<i64: 32, 64>}, {pipeline_mode = #tpu.pipeline_mode<synchronous>, transform_indices = @transform_4, window_bounds = array<i64: 1, 64>}, {pipeline_mode = #tpu.pipeline_mode<synchronous>, transform_indices = @transform_5, window_bounds = array<i64: 192, 128>}, {pipeline_mode = #tpu.pipeline_mode<synchronous>, transform_indices = @transform_6, window_bounds = array<i64: 1, 128>}, {pipeline_mode = #tpu.pipeline_mode<synchronous>, transform_indices = @transform_7, window_bounds = array<i64: 64, 512>}, {pipeline_mode = #tpu.pipeline_mode<synchronous>, transform_indices = @transform_8, window_bounds = array<i64: 1, 512>}, {pipeline_mode = #tpu.pipeline_mode<synchronous>, transform_indices = @transform_9, window_bounds = array<i64: 512, 32>}, {pipeline_mode = #tpu.pipeline_mode<synchronous>, transform_indices = @transform_10, window_bounds = array<i64: 1, 32>}, {pipeline_mode = #tpu.pipeline_mode<synchronous>, transform_indices = @transform_11, window_bounds = array<i64: 128, 128>}, {pipeline_mode = #tpu.pipeline_mode<synchronous>, transform_indices = @transform_12, window_bounds = array<i64: 32, 128>}, {pipeline_mode = #tpu.pipeline_mode<synchronous>, transform_indices = @transform_13, window_bounds = array<i64: 1, 128>}, {transform_indices = @transform_14, window_bounds = array<i64: 8, 128>}]} {
    %c0 = arith.constant 0 : index
    %c0_0 = arith.constant 0 : index
    %0 = vector.load %arg1[%c0, %c0_0] : memref<8x32xf32, #tpu.memory_space<vmem>>, vector<8x32xf32>
    %1 = arith.truncf %0 : vector<8x32xf32> to vector<8x32xbf16>
    %c0_1 = arith.constant 0 : index
    %c0_2 = arith.constant 0 : index
    %2 = vector.load %arg2[%c0_1, %c0_2] : memref<32x192xbf16, #tpu.memory_space<vmem>>, vector<32x192xbf16>
    %cst = arith.constant dense<0.000000e+00> : vector<8x192xf32>
    %3 = tpu.matmul %1, %2, %cst {dimension_numbers = #tpu.dot_dimension_numbers<[1], [0], [0], [1], [0, 0, 1, 1], [], []>} : vector<8x32xbf16>, vector<32x192xbf16>, vector<8x192xf32> -> vector<8x192xf32>
    %c0_3 = arith.constant 0 : index
    %c0_4 = arith.constant 0 : index
    %4 = vector.load %arg3[%c0_3, %c0_4] : memref<1x192xf32, #tpu.memory_space<vmem>>, vector<1x192xf32>
    %5 = vector.broadcast %4 : vector<1x192xf32> to vector<8x192xf32>
    %6 = arith.addf %3, %5 : vector<8x192xf32>
    %cst_5 = arith.constant 0.000000e+00 : f32
    %7 = vector.broadcast %cst_5 : f32 to vector<8x192xf32>
    %8 = arith.maximumf %6, %7 : vector<8x192xf32>
    %c0_6 = arith.constant 0 : index
    %c0_7 = arith.constant 0 : index
    %9 = vector.load %arg4[%c0_6, %c0_7] : memref<32x64xbf16, #tpu.memory_space<vmem>>, vector<32x64xbf16>
    %cst_8 = arith.constant dense<0.000000e+00> : vector<8x64xf32>
    %10 = tpu.matmul %1, %9, %cst_8 {dimension_numbers = #tpu.dot_dimension_numbers<[1], [0], [0], [1], [0, 0, 1, 1], [], []>} : vector<8x32xbf16>, vector<32x64xbf16>, vector<8x64xf32> -> vector<8x64xf32>
    %c0_9 = arith.constant 0 : index
    %c0_10 = arith.constant 0 : index
    %11 = vector.load %arg5[%c0_9, %c0_10] : memref<1x64xf32, #tpu.memory_space<vmem>>, vector<1x64xf32>
    %12 = vector.broadcast %11 : vector<1x64xf32> to vector<8x64xf32>
    %13 = arith.addf %10, %12 : vector<8x64xf32>
    %cst_11 = arith.constant 0.000000e+00 : f32
    %14 = vector.broadcast %cst_11 : f32 to vector<8x64xf32>
    %15 = arith.maximumf %13, %14 : vector<8x64xf32>
    %16 = arith.truncf %8 : vector<8x192xf32> to vector<8x192xbf16>
    %c0_12 = arith.constant 0 : index
    %c0_13 = arith.constant 0 : index
    %17 = vector.load %arg6[%c0_12, %c0_13] : memref<192x128xbf16, #tpu.memory_space<vmem>>, vector<192x128xbf16>
    %cst_14 = arith.constant dense<0.000000e+00> : vector<8x128xf32>
    %18 = tpu.matmul %16, %17, %cst_14 {dimension_numbers = #tpu.dot_dimension_numbers<[1], [0], [0], [1], [0, 0, 1, 1], [], []>} : vector<8x192xbf16>, vector<192x128xbf16>, vector<8x128xf32> -> vector<8x128xf32>
    %c0_15 = arith.constant 0 : index
    %c0_16 = arith.constant 0 : index
    %19 = vector.load %arg7[%c0_15, %c0_16] : memref<1x128xf32, #tpu.memory_space<vmem>>, vector<1x128xf32>
    %20 = vector.broadcast %19 : vector<1x128xf32> to vector<8x128xf32>
    %21 = arith.addf %18, %20 : vector<8x128xf32>
    %cst_17 = arith.constant 0.000000e+00 : f32
    %22 = vector.broadcast %cst_17 : f32 to vector<8x128xf32>
    %23 = arith.maximumf %21, %22 : vector<8x128xf32>
    %24 = arith.truncf %15 : vector<8x64xf32> to vector<8x64xbf16>
    %c0_18 = arith.constant 0 : index
    %c0_19 = arith.constant 0 : index
    %25 = vector.load %arg8[%c0_18, %c0_19] : memref<64x512xbf16, #tpu.memory_space<vmem>>, vector<64x512xbf16>
    %cst_20 = arith.constant dense<0.000000e+00> : vector<8x512xf32>
    %26 = tpu.matmul %24, %25, %cst_20 {dimension_numbers = #tpu.dot_dimension_numbers<[1], [0], [0], [1], [0, 0, 1, 1], [], []>} : vector<8x64xbf16>, vector<64x512xbf16>, vector<8x512xf32> -> vector<8x512xf32>
    %c0_21 = arith.constant 0 : index
    %c0_22 = arith.constant 0 : index
    %27 = vector.load %arg9[%c0_21, %c0_22] : memref<1x512xf32, #tpu.memory_space<vmem>>, vector<1x512xf32>
    %28 = vector.broadcast %27 : vector<1x512xf32> to vector<8x512xf32>
    %29 = arith.addf %26, %28 : vector<8x512xf32>
    %cst_23 = arith.constant 0.000000e+00 : f32
    %30 = vector.broadcast %cst_23 : f32 to vector<8x512xf32>
    %31 = arith.maximumf %29, %30 : vector<8x512xf32>
    %32 = arith.truncf %31 : vector<8x512xf32> to vector<8x512xbf16>
    %c0_24 = arith.constant 0 : index
    %c0_25 = arith.constant 0 : index
    %33 = vector.load %arg10[%c0_24, %c0_25] : memref<512x32xbf16, #tpu.memory_space<vmem>>, vector<512x32xbf16>
    %cst_26 = arith.constant dense<0.000000e+00> : vector<8x32xf32>
    %34 = tpu.matmul %32, %33, %cst_26 {dimension_numbers = #tpu.dot_dimension_numbers<[1], [0], [0], [1], [0, 0, 1, 1], [], []>} : vector<8x512xbf16>, vector<512x32xbf16>, vector<8x32xf32> -> vector<8x32xf32>
    %c0_27 = arith.constant 0 : index
    %c0_28 = arith.constant 0 : index
    %35 = vector.load %arg11[%c0_27, %c0_28] : memref<1x32xf32, #tpu.memory_space<vmem>>, vector<1x32xf32>
    %36 = vector.broadcast %35 : vector<1x32xf32> to vector<8x32xf32>
    %37 = arith.addf %34, %36 : vector<8x32xf32>
    %cst_29 = arith.constant 0.000000e+00 : f32
    %38 = vector.broadcast %cst_29 : f32 to vector<8x32xf32>
    %39 = arith.maximumf %37, %38 : vector<8x32xf32>
    %40 = arith.truncf %23 : vector<8x128xf32> to vector<8x128xbf16>
    %c0_30 = arith.constant 0 : index
    %c0_31 = arith.constant 0 : index
    %41 = vector.load %arg12[%c0_30, %c0_31] : memref<128x128xbf16, #tpu.memory_space<vmem>>, vector<128x128xbf16>
    %cst_32 = arith.constant dense<0.000000e+00> : vector<8x128xf32>
    %42 = tpu.matmul %40, %41, %cst_32 {dimension_numbers = #tpu.dot_dimension_numbers<[1], [0], [0], [1], [0, 0, 1, 1], [], []>} : vector<8x128xbf16>, vector<128x128xbf16>, vector<8x128xf32> -> vector<8x128xf32>
    %43 = arith.truncf %39 : vector<8x32xf32> to vector<8x32xbf16>
    %c0_33 = arith.constant 0 : index
    %c0_34 = arith.constant 0 : index
    %44 = vector.load %arg13[%c0_33, %c0_34] : memref<32x128xbf16, #tpu.memory_space<vmem>>, vector<32x128xbf16>
    %cst_35 = arith.constant dense<0.000000e+00> : vector<8x128xf32>
    %45 = tpu.matmul %43, %44, %cst_35 {dimension_numbers = #tpu.dot_dimension_numbers<[1], [0], [0], [1], [0, 0, 1, 1], [], []>} : vector<8x32xbf16>, vector<32x128xbf16>, vector<8x128xf32> -> vector<8x128xf32>
    %46 = arith.addf %42, %45 : vector<8x128xf32>
    %c0_36 = arith.constant 0 : index
    %c0_37 = arith.constant 0 : index
    %47 = vector.load %arg14[%c0_36, %c0_37] : memref<1x128xf32, #tpu.memory_space<vmem>>, vector<1x128xf32>
    %48 = vector.broadcast %47 : vector<1x128xf32> to vector<8x128xf32>
    %49 = arith.addf %46, %48 : vector<8x128xf32>
    %c0_38 = arith.constant 0 : index
    %c0_39 = arith.constant 0 : index
    %50 = vector.load %arg15[%c0_38, %c0_39] : memref<8x128xf32, #tpu.memory_space<vmem>>, vector<8x128xf32>
    tpu.vector_store %arg15[%c0_38, %c0_39], %49 {strides = array<i32>} : memref<8x128xf32, #tpu.memory_space<vmem>>, vector<8x128xf32>,
    return
  }
  func.func @transform_0(%arg0: i32) -> (i32, i32) {
    %c0_i32 = arith.constant 0 : i32
    %c0_i32_0 = arith.constant 0 : i32
    return %arg0, %c0_i32 : i32, i32
  }
  func.func @transform_1(%arg0: i32) -> (i32, i32) {
    %c0_i32 = arith.constant 0 : i32
    %c0_i32_0 = arith.constant 0 : i32
    %c0_i32_1 = arith.constant 0 : i32
    return %c0_i32, %c0_i32_0 : i32, i32
  }
  func.func @transform_2(%arg0: i32) -> (i32, i32) {
    %c0_i32 = arith.constant 0 : i32
    %c0_i32_0 = arith.constant 0 : i32
    %c0_i32_1 = arith.constant 0 : i32
    return %c0_i32, %c0_i32_0 : i32, i32
  }
  func.func @transform_3(%arg0: i32) -> (i32, i32) {
    %c0_i32 = arith.constant 0 : i32
    %c0_i32_0 = arith.constant 0 : i32
    %c0_i32_1 = arith.constant 0 : i32
    return %c0_i32, %c0_i32_0 : i32, i32
  }
  func.func @transform_4(%arg0: i32) -> (i32, i32) {
    %c0_i32 = arith.constant 0 : i32
    %c0_i32_0 = arith.constant 0 : i32
    %c0_i32_1 = arith.constant 0 : i32
    return %c0_i32, %c0_i32_0 : i32, i32
  }
  func.func @transform_5(%arg0: i32) -> (i32, i32) {
    %c0_i32 = arith.constant 0 : i32
    %c0_i32_0 = arith.constant 0 : i32
    %c0_i32_1 = arith.constant 0 : i32
    return %c0_i32, %c0_i32_0 : i32, i32
  }
  func.func @transform_6(%arg0: i32) -> (i32, i32) {
    %c0_i32 = arith.constant 0 : i32
    %c0_i32_0 = arith.constant 0 : i32
    %c0_i32_1 = arith.constant 0 : i32
    return %c0_i32, %c0_i32_0 : i32, i32
  }
  func.func @transform_7(%arg0: i32) -> (i32, i32) {
    %c0_i32 = arith.constant 0 : i32
    %c0_i32_0 = arith.constant 0 : i32
    %c0_i32_1 = arith.constant 0 : i32
    return %c0_i32, %c0_i32_0 : i32, i32
  }
  func.func @transform_8(%arg0: i32) -> (i32, i32) {
    %c0_i32 = arith.constant 0 : i32
    %c0_i32_0 = arith.constant 0 : i32
    %c0_i32_1 = arith.constant 0 : i32
    return %c0_i32, %c0_i32_0 : i32, i32
  }
  func.func @transform_9(%arg0: i32) -> (i32, i32) {
    %c0_i32 = arith.constant 0 : i32
    %c0_i32_0 = arith.constant 0 : i32
    %c0_i32_1 = arith.constant 0 : i32
    return %c0_i32, %c0_i32_0 : i32, i32
  }
  func.func @transform_10(%arg0: i32) -> (i32, i32) {
    %c0_i32 = arith.constant 0 : i32
    %c0_i32_0 = arith.constant 0 : i32
    %c0_i32_1 = arith.constant 0 : i32
    return %c0_i32, %c0_i32_0 : i32, i32
  }
  func.func @transform_11(%arg0: i32) -> (i32, i32) {
    %c0_i32 = arith.constant 0 : i32
    %c0_i32_0 = arith.constant 0 : i32
    %c0_i32_1 = arith.constant 0 : i32
    return %c0_i32, %c0_i32_0 : i32, i32
  }
  func.func @transform_12(%arg0: i32) -> (i32, i32) {
    %c0_i32 = arith.constant 0 : i32
    %c0_i32_0 = arith.constant 0 : i32
    %c0_i32_1 = arith.constant 0 : i32
    return %c0_i32, %c0_i32_0 : i32, i32
  }
  func.func @transform_13(%arg0: i32) -> (i32, i32) {
    %c0_i32 = arith.constant 0 : i32
    %c0_i32_0 = arith.constant 0 : i32
    %c0_i32_1 = arith.constant 0 : i32
    return %c0_i32, %c0_i32_0 : i32, i32
  }
  func.func @transform_14(%arg0: i32) -> (i32, i32) {
    %c0_i32 = arith.constant 0 : i32
    %c0_i32_0 = arith.constant 0 : i32
    return %arg0, %c0_i32 : i32, i32
  }
}

</mosaic_0001>

<bundles_post_ra>
// kernel: forward.1
= control target key start
LH: loop header
LB: loop body
LE: loop exit
PB: predicated region body
PF: predicated region fallthrough
CT: control target
= control target key end

     0   :  { %19 = vsyncpa [#allocation3], 0  ;;  %s2051_s0 = inlined_call_operand.vmem [shape: f32[8,32], index: 0, kind: input, shape index: {}]   ;;  %s2052_s1 = inlined_call_operand.vmem [shape: bf16[32,192], index: 1, kind: input, shape index: {}]   ;;  %s2053_s2 = inlined_call_operand.hbm [shape: f32[1,192], index: 2, kind: input, shape index: {}]   ;;  %s2054_s3 = inlined_call_operand.hbm [shape: bf16[32,64], index: 3, kind: input, shape index: {}]   ;;  %s2055_s4 = inlined_call_operand.hbm [shape: f32[1,64], index: 4, kind: input, shape index: {}]   ;;  %s2056_s5 = inlined_call_operand.vmem [shape: bf16[192,128], index: 5, kind: input, shape index: {}]   ;;  %s2057_s6 = inlined_call_operand.hbm [shape: f32[1,128], index: 6, kind: input, shape index: {}]   ;;  %s2058_s7 = inlined_call_operand.vmem [shape: bf16[64,512], index: 7, kind: input, shape index: {}]   ;;  %s2059_s8 = inlined_call_operand.vmem [shape: f32[1,512], index: 8, kind: input, shape index: {}]   ;;  %s2060_s9 = inlined_call_operand.vmem [shape: bf16[512,32], index: 9, kind: input, shape index: {}]   ;;  %s2061_s10 = inlined_call_operand.hbm [shape: f32[1,32], index: 10, kind: input, shape index: {}]   ;;  %s2062_s11 = inlined_call_operand.hbm [shape: bf16[128,128], index: 11, kind: input, shape index: {}]   ;;  %s2063_s12 = inlined_call_operand.vmem [shape: bf16[32,128], index: 12, kind: input, shape index: {}]   ;;  %s2064_s13 = inlined_call_operand.hbm [shape: f32[1,128], index: 13, kind: input, shape index: {}]   ;;  %s2065_s14 = inlined_call_operand.vmem [shape: f32[8,128], index: 14, kind: output, shape index: {}]  }
   0x1   :  { %20 = vsyncpa [#allocation5], 0 }
   0x2   :  { %21 = vsyncpa [#allocation8], 0 }
   0x3   :  { %22 = vsyncpa [#allocation11], 0  ;;  %s1611_s29 = smov [#allocation4]   ;;  %s1449_s17 = scalar_lea.hbm %s2054_s3, 256 }
   0x4   :  { %s42_s30 = sshll.u32 %s1611_s29, 4  ;;  %p1450_p0 = scmp.ne.s32.totalorder %s2054_s3, %s1449_s17  ;;  %s43_s30 = int_to_ptr.vmem [resolvable:$true] %s42_s30 }
   0x5   :  { %p1453_p1 = scmp.lt.u32.totalorder %s1449_s17, %s2054_s3 }
   0x7   :  { %p1455_p2 = pnand %p1453_p1, %p1450_p0 }
   0x9   :  { %1458 = shalt.err (!%p1455_p2)
}
   0xa   :  { %s1459_s22 = scalar_lea.vmem %s43_s30, 256  ;;  %p1464_p4 = scmp.lt.s32.totalorder %s43_s30, %s43_s30 }
   0xb   :  { %p1460_p3 = scmp.ne.s32.totalorder %s43_s30, %s1459_s22  ;;  %p1465_p5 = scmp.lt.s32.totalorder %s1459_s22, %s1459_s22 }
   0xd   :  { %p1466_p6 = por %p1465_p5, %p1464_p4 }
   0xf   :  { %p1467_p7 = pnand %p1466_p6, %p1460_p3 }
  0x11   :  { %1470 = shalt.err (!%p1467_p7)
}
  0x12   :  { %s1612_s23 = smov 64   ;;  %s1613_s24 = smov 4  }
  0x13   :  { %48 = dma.hbm_to_vmem [thread:$0]  %s2054_s3, 256, %s43_s30, [#allocation5], %s1612_s23, %s1612_s23, %s1613_s24  }
  0x14   :  { %s1614_s27 = smov [#allocation7]   ;;  %s1615_s29 = smov [#allocation10]  }
  0x15   :  { %s67_s28 = sshll.u32 %s1614_s27, 4  ;;  %s92_s15 = sshll.u32 %s1615_s29, 4  ;;  %s68_s28 = int_to_ptr.vmem [resolvable:$true] %s67_s28  ;;  %s93_s15 = int_to_ptr.vmem [resolvable:$true] %s92_s15 }
  0x16   :  { %s1471_s18 = scalar_lea.hbm %s2057_s6, 16 }
  0x17   :  { %p1472_p8 = scmp.ne.s32.totalorder %s2057_s6, %s1471_s18  ;;  %p1475_p9 = scmp.lt.u32.totalorder %s1471_s18, %s2057_s6 }
  0x19   :  { %p1477_p10 = pnand %p1475_p9, %p1472_p8 }
  0x1b   :  { %1480 = shalt.err (!%p1477_p10)
}
  0x1c   :  { %s1481_s3 = scalar_lea.vmem %s68_s28, 16  ;;  %s1485_s30 = scalar_lea.vmem %s68_s28, 32 }
  0x1d   :  { %p1482_p11 = scmp.ne.s32.totalorder %s68_s28, %s1481_s3  ;;  %p1486_p12 = scmp.lt.s32.totalorder %s68_s28, %s68_s28 }
  0x1e   :  { %p1487_p13 = scmp.lt.s32.totalorder %s1485_s30, %s1481_s3 }
  0x20   :  { %p1488_p0 = por %p1487_p13, %p1486_p12 }
  0x22   :  { %p1489_p1 = pnand %p1488_p0, %p1482_p11 }
  0x24   :  { %1492 = shalt.err (!%p1489_p1)
}
  0x25   :  { %70 = dma.hbm_to_vmem [thread:$0]  %s2057_s6, 16, %s68_s28, [#allocation8]  }
  0x26   :  { %s1493_s16 = scalar_lea.hbm %s2062_s11, 1024 }
  0x27   :  { %p1494_p2 = scmp.ne.s32.totalorder %s2062_s11, %s1493_s16  ;;  %p1497_p3 = scmp.lt.u32.totalorder %s1493_s16, %s2062_s11 }
  0x29   :  { %p1499_p4 = pnand %p1497_p3, %p1494_p2 }
  0x2b   :  { %1502 = shalt.err (!%p1499_p4)
}
  0x2c   :  { %s1503_s21 = scalar_lea.vmem %s93_s15, 1024  ;;  %p1508_p6 = scmp.lt.s32.totalorder %s93_s15, %s93_s15 }
  0x2d   :  { %p1504_p5 = scmp.ne.s32.totalorder %s93_s15, %s1503_s21  ;;  %p1509_p7 = scmp.lt.s32.totalorder %s1503_s21, %s1503_s21 }
  0x2f   :  { %p1510_p8 = por %p1509_p7, %p1508_p6 }
  0x31   :  { %p1511_p9 = pnand %p1510_p8, %p1504_p5 }
  0x33   :  { %1514 = shalt.err (!%p1511_p9)
}
  0x34   :  { %98 = dma.hbm_to_vmem [thread:$0]  %s2062_s11, 1024, %s93_s15, [#allocation11], %s1612_s23, %s1612_s23, %s1613_s24  }
  0x35   :  { %s1616_s22 = smov [#allocation2]   ;;  %s1617_s30 = smov [#allocation6]  }
  0x36   :  { %s33_s3 = sshll.u32 %s1616_s22, 4  ;;  %s55_s25 = sshll.u32 %s1617_s30, 4  ;;  %s34_s3 = int_to_ptr.vmem [resolvable:$true] %s33_s3  ;;  %s56_s25 = int_to_ptr.vmem [resolvable:$true] %s55_s25 }
  0x37   :  { %s1515_s29 = scalar_lea.hbm %s2053_s2, 32 }
  0x38   :  { %p1516_p10 = scmp.ne.s32.totalorder %s2053_s2, %s1515_s29  ;;  %p1519_p11 = scmp.lt.u32.totalorder %s1515_s29, %s2053_s2 }
  0x3a   :  { %p1521_p12 = pnand %p1519_p11, %p1516_p10 }
  0x3c   :  { %1524 = shalt.err (!%p1521_p12)
}
  0x3d   :  { %s1525_s11 = scalar_lea.vmem %s34_s3, 32  ;;  %p1530_p0 = scmp.lt.s32.totalorder %s34_s3, %s34_s3 }
  0x3e   :  { %p1526_p13 = scmp.ne.s32.totalorder %s34_s3, %s1525_s11  ;;  %p1531_p1 = scmp.lt.s32.totalorder %s1525_s11, %s1525_s11 }
  0x40   :  { %p1532_p2 = por %p1531_p1, %p1530_p0 }
  0x42   :  { %p1533_p3 = pnand %p1532_p2, %p1526_p13 }
  0x44   :  { %1536 = shalt.err (!%p1533_p3)
}
  0x45   :  { %36 = dma.hbm_to_vmem [thread:$0]  %s2053_s2, 32, %s34_s3, [#allocation3]  }
  0x46   :  { %s1537_s21 = scalar_lea.hbm %s2055_s4, 16 }
  0x47   :  { %p1538_p4 = scmp.ne.s32.totalorder %s2055_s4, %s1537_s21  ;;  %p1541_p5 = scmp.lt.u32.totalorder %s1537_s21, %s2055_s4 }
  0x49   :  { %p1543_p6 = pnand %p1541_p5, %p1538_p4 }
  0x4b   :  { %1546 = shalt.err (!%p1543_p6)
}
  0x4c   :  { %s1547_s26 = scalar_lea.vmem %s56_s25, 16  ;;  %s1551_s27 = scalar_lea.vmem %s56_s25, 32 }
  0x4d   :  { %p1548_p7 = scmp.ne.s32.totalorder %s56_s25, %s1547_s26  ;;  %p1552_p8 = scmp.lt.s32.totalorder %s56_s25, %s56_s25 }
  0x4e   :  { %p1553_p9 = scmp.lt.s32.totalorder %s1551_s27, %s1547_s26 }
  0x50   :  { %p1554_p10 = por %p1553_p9, %p1552_p8 }
  0x52   :  { %p1555_p11 = pnand %p1554_p10, %p1548_p7 }
  0x54   :  { %1558 = shalt.err (!%p1555_p11)
}
  0x55   :  { %58 = dma.hbm_to_vmem [thread:$0]  %s2055_s4, 16, %s56_s25, [#allocation5]  }
  0x56   :  { %s1618_s29 = smov [#allocation9]   ;;  %s1619_s17 = smov [#allocation12]  }
  0x57   :  { %s83_s16 = sshll.u32 %s1618_s29, 4  ;;  %s107_s18 = sshll.u32 %s1619_s17, 4  ;;  %s84_s16 = int_to_ptr.vmem [resolvable:$true] %s83_s16  ;;  %s108_s18 = int_to_ptr.vmem [resolvable:$true] %s107_s18 }
  0x58   :  { %s1559_s23 = scalar_lea.hbm %s2061_s10, 16 }
  0x59   :  { %p1560_p12 = scmp.ne.s32.totalorder %s2061_s10, %s1559_s23  ;;  %p1563_p13 = scmp.lt.u32.totalorder %s1559_s23, %s2061_s10 }
  0x5b   :  { %p1565_p0 = pnand %p1563_p13, %p1560_p12 }
  0x5d   :  { %1568 = shalt.err (!%p1565_p0)
}
  0x5e   :  { %s1569_s4 = scalar_lea.vmem %s84_s16, 16  ;;  %s1573_s25 = scalar_lea.vmem %s84_s16, 32 }
  0x5f   :  { %p1570_p1 = scmp.ne.s32.totalorder %s84_s16, %s1569_s4  ;;  %p1574_p2 = scmp.lt.s32.totalorder %s84_s16, %s84_s16 }
  0x60   :  { %p1575_p3 = scmp.lt.s32.totalorder %s1573_s25, %s1569_s4 }
  0x62   :  { %p1576_p4 = por %p1575_p3, %p1574_p2 }
  0x64   :  { %p1577_p5 = pnand %p1576_p4, %p1570_p1 }
  0x66   :  { %1580 = shalt.err (!%p1577_p5)
}
  0x67   :  { %86 = dma.hbm_to_vmem [thread:$0]  %s2061_s10, 16, %s84_s16, [#allocation8]  }
  0x68   :  { %s1581_s26 = scalar_lea.hbm %s2064_s13, 16 }
  0x69   :  { %p1582_p6 = scmp.ne.s32.totalorder %s2064_s13, %s1581_s26  ;;  %p1585_p7 = scmp.lt.u32.totalorder %s1581_s26, %s2064_s13 }
  0x6b   :  { %p1587_p8 = pnand %p1585_p7, %p1582_p6 }
  0x6d   :  { %1590 = shalt.err (!%p1587_p8)
}
  0x6e   :  { %s1591_s17 = scalar_lea.vmem %s108_s18, 16  ;;  %s1595_s19 = scalar_lea.vmem %s108_s18, 32 }
  0x6f   :  { %p1592_p9 = scmp.ne.s32.totalorder %s108_s18, %s1591_s17  ;;  %p1596_p10 = scmp.lt.s32.totalorder %s108_s18, %s108_s18 }
  0x70   :  { %p1597_p11 = scmp.lt.s32.totalorder %s1595_s19, %s1591_s17 }
  0x72   :  { %p1598_p12 = por %p1597_p11, %p1596_p10 }
  0x74   :  { %p1599_p13 = pnand %p1598_p12, %p1592_p9 }
  0x76   :  { %1602 = shalt.err (!%p1599_p13)
}
  0x77   :  { %110 = dma.hbm_to_vmem [thread:$0]  %s2064_s13, 16, %s108_s18, [#allocation11]  }
  0x78   :  { %1603 = dma.done.wait [#allocation3], 32  }
  0x79   :  { %1604 = vsyncadd [#allocation3], 4294967264 }
  0x7a   :  { %1605 = dma.done.wait [#allocation5], 272  }
  0x7b   :  { %1606 = vsyncadd [#allocation5], 4294967024 }
  0x7c   :  { %1607 = dma.done.wait [#allocation8], 32  }
  0x7d   :  { %1608 = vsyncadd [#allocation8], 4294967264 }
  0x7e   :  { %1609 = dma.done.wait [#allocation11], 1040  }
  0x7f   :  { %1610 = vsyncadd [#allocation11], 4294966256  ;;  %v1620_v0 = vmov 0   ;;  %v1363_v1 = vld [vmem:[%s2052_s1 + $0x4] ss:$8 sps:$4 sm:$0xff]   ;;  %vm171_vm0 = vcmask 261120   ;;  %v141_v32 = vlaneseq }
  0x80   :  { %207 = vmatprep.mubr.bf16.mxu0 %v1620_v0  ;;  %586 = vmatprep.mubr.bf16.mxu1 %v1620_v0  ;;  %v1365_v2 = vld [vmem:[%s2052_s1] ss:$8 sps:$4 sm:$0xff]   ;;  %v1366_v3 = vld [vmem:[%s2052_s1 + $0x14] ss:$8 sps:$4 sm:$0xff]   ;;  %v1368_v4 = vld [vmem:[%s2052_s1 + $0x10] ss:$8 sps:$4 sm:$0xff]  }
  0x81   :  { %175 = vmatprep.subr.bf16.mxu0 %v1363_v1  ;;  %v133_v5 = vld [vmem:[%s2051_s0] sm:$0xff]  ;;  %v1621_v8 = vmov 0.0   ;;  %v1370_v9 = vld [vmem:[#allocation4 + $0x8] sm:$0xff]   ;;  %vm1622_vm1 = vmmov 0   ;;  %v1374_v15 = vld [vmem:[%s2056_s5 + $0x18] sm:$0xff]   ;;  %v1889_v33 = vshrl.u32 %v141_v32, 7 }
  0x82   :  { %176 = vmatpush1.bf16.msra.mxu0 %v1365_v2  ;;  %v134_v6 = vpack.c.bf16 %v133_v5, %v133_v5  ;;  %v1369_v7 = vld [vmem:[#allocation4] sm:$0xff]   ;;  %v1373_v14 = vld [vmem:[%s2056_s5 + $0x10] sm:$0xff]   ;;  %v1378_v19 = vld [vmem:[%s2056_s5 + $0x38] sm:$0xff]   ;;  %vm387_vm2 = vcmask 523264  }
  0x83   :  { %177 = vmatprep.subr.bf16.mxu0 %v1366_v3  ;;  %v1371_v10 = vld [vmem:[%s2056_s5] sm:$0xff]   ;;  %v1372_v13 = vld [vmem:[%s2056_s5 + $0x8] sm:$0xff]   ;;  %v1377_v18 = vld [vmem:[%s2056_s5 + $0x30] sm:$0xff]   ;;  %v143_v34 = vsub.s32 0, %v1889_v33  ;;  %v147_v36 = vsub.s32 1, %v1889_v33 }
  0x84   :  { %v1381_v11 = vld [vmem:[%s2058_s7 + $0x4] ss:$16 sps:$4 sm:$0xff]   ;;  %v1383_v12 = vld [vmem:[%s2058_s7] ss:$16 sps:$4 sm:$0xff]   ;;  %v1376_v17 = vld [vmem:[%s2056_s5 + $0x28] sm:$0xff]  }
  0x85   :  { %554 = vmatprep.subr.bf16.mxu1 %v1381_v11  ;;  %v1375_v16 = vld [vmem:[%s2056_s5 + $0x20] sm:$0xff]   ;;  %v1380_v21 = vld [vmem:[%s2056_s5 + $0x48] sm:$0xff]   ;;  %v1384_v22 = vld [vmem:[%s2056_s5 + $0x50] sm:$0xff]  }
  0x86   :  { %178 = vmatpush1.bf16.msra.mxu0 %v1368_v4  ;;  %555 = vmatpush1.bf16.msra.mxu1 %v1383_v12  ;;  %v1379_v20 = vld [vmem:[%s2056_s5 + $0x40] sm:$0xff]   ;;  %v1388_v25 = vld [vmem:[%s2056_s5 + $0x58] sm:$0xff]   ;;  %v1175_v48 = vld [vmem:[#allocation6] ss:$0 sm:$0xff] }
  0x87   :  { %1315 = vmatprep.subr.bf16.mxu0 %v1621_v8  ;;  %v1385_v23 = vld [vmem:[%s2058_s7 + $0x24] ss:$16 sps:$4 sm:$0xff]   ;;  %v1387_v24 = vld [vmem:[%s2058_s7 + $0x20] ss:$16 sps:$4 sm:$0xff]   ;;  %v1397_v30 = vld [vmem:[%s2058_s7 + $0xc] ss:$16 sps:$4 sm:$0xff]  }
  0x88   :  { %556 = vmatprep.subr.bf16.mxu1 %v1385_v23  ;;  %v1389_v26 = vld [vmem:[%s2058_s7 + $0x44] ss:$16 sps:$4 sm:$0xff]   ;;  %v1391_v27 = vld [vmem:[%s2058_s7 + $0x40] ss:$16 sps:$4 sm:$0xff]   ;;  %v1395_v57 = vld [vmem:[%s2058_s7 + $0x8] ss:$16 sps:$4 sm:$0xff]  }
  0x89   :  { %1174 = vmatmul.mubr.msk.bf16.vlgmr.msra.gmra.mrb[0].mxu0 %vm171_vm0, %v134_v6  ;;  %v1392_v28 = vld [vmem:[%s2058_s7 + $0x64] ss:$16 sps:$4 sm:$0xff]   ;;  %v1394_v29 = vld [vmem:[%s2058_s7 + $0x60] ss:$16 sps:$4 sm:$0xff]   ;;  %v1400_v59 = vld [vmem:[%s2058_s7 + $0x2c] ss:$16 sps:$4 sm:$0xff]  }
  0x8a   :  { %1316 = vmatpush3.bf16.msra.mxu0 %v1369_v7  ;;  %1319 = vmatprep.mubr.msk.bf16.mxu0 %vm1622_vm1, %v1621_v8  ;;  %v1415_v31 = vld [vmem:[%s2060_s9 + $0xc0] sm:$0xff]   ;;  %v1398_v60 = vld [vmem:[%s2058_s7 + $0x28] ss:$16 sps:$4 sm:$0xff]   ;;  %v1403_v61 = vld [vmem:[%s2058_s7 + $0x4c] ss:$16 sps:$4 sm:$0xff]  }
  0x8b   :  { %1317 = vmatprep.subr.bf16.mxu0 %v1621_v8  ;;  %557 = vmatpush1.bf16.msra.mxu1 %v1387_v24  ;;  %v139_v35 = vld [vmem:[#allocation2] sm:$0x3]  ;;  %v1401_v62 = vld [vmem:[%s2058_s7 + $0x48] ss:$16 sps:$4 sm:$0xff]   ;;  %v1406_v63 = vld [vmem:[%s2058_s7 + $0x6c] ss:$16 sps:$4 sm:$0xff]  }
  0x8c   :  { %558 = vmatprep.subr.bf16.mxu1 %v1389_v26  ;;  %v144_v37 = vrot.slane %v139_v35, %v143_v34  ;;  %v148_v38 = vrot.slane %v139_v35, %v147_v36  ;;  %v1417_v49 = vld [vmem:[%s2060_s9 + $0x80] sm:$0xff]   ;;  %v1409_v3 = vld [vmem:[%s2060_s9 + $0x48] sm:$0xff]   ;;  %v1411_v5 = vld [vmem:[%s2060_s9 + $0x50] sm:$0xff]  }
  0x8d   :  { %v1407_v1 = vld [vmem:[%s2060_s9 + $0x40] sm:$0xff]   ;;  %v1410_v4 = vld [vmem:[%s2060_s9 + $0x8] sm:$0xff]   ;;  %v1413_v7 = vld [vmem:[%s2060_s9 + $0x58] sm:$0xff]  }
  0x8e   :  { %1318 = vmatpush3.bf16.msra.mxu0 %v1370_v9  ;;  %v1408_v2 = vld [vmem:[%s2060_s9] sm:$0xff]   ;;  %v1414_v9 = vld [vmem:[%s2060_s9 + $0x18] sm:$0xff]   ;;  %v1419_v12 = vld [vmem:[%s2060_s9 + $0xc8] sm:$0xff]  }
  0x8f   :  { %391 = vmatprep.subr.bf16.mxu0 %v1620_v0  ;;  %559 = vmatpush1.bf16.msra.mxu1 %v1391_v27  ;;  %v1418_v11 = vld [vmem:[%s2060_s9 + $0x20] sm:$0xff]   ;;  %v1430_v23 = vld [vmem:[%s2060_s9 + $0x38] sm:$0xff]   ;;  %v1433_v26 = vld [vmem:[%s2060_s9 + $0xe8] sm:$0xff]  }
  0x90   :  { %560 = vmatprep.subr.bf16.mxu1 %v1392_v28  ;;  %v1431_v24 = vld [vmem:[%s2060_s9 + $0xe0] sm:$0xff]   ;;  %v1434_v27 = vld [vmem:[%s2060_s9 + $0xa8] sm:$0xff]   ;;  %v1435_v28 = vld [vmem:[%s2060_s9 + $0xf0] sm:$0xff]  }
  0x91   :  { %1320 = vmatmul.mubr.msk.bf16.vlgmr.msra.gmra.mrb[4].mxu0 %vm171_vm0, %v134_v6  ;;  %v1412_v6 = vld [vmem:[%s2060_s9 + $0x10] sm:$0xff]   ;;  %v449_v35 = vld [vmem:[%s2059_s8] sm:$0xf] }
  0x92   :  { %392 = vmatpush1.bf16.msra.mxu0 %v1371_v10  ;;  %v1416_v10 = vld [vmem:[%s2060_s9 + $0x60] sm:$0xff]  }
  0x93   :  { %393 = vmatprep.subr.bf16.mxu0 %v1620_v0  ;;  %561 = vmatpush1.bf16.msra.mxu1 %v1394_v29  ;;  %v1436_v29 = vld [vmem:[%s2060_s9 + $0xb0] sm:$0xff]  }
  0x94   :  { %595 = vmatprep.subr.bf16.mxu1 %v1397_v30  ;;  %v1437_v30 = vld [vmem:[%s2060_s9 + $0xf8] sm:$0xff]  }
  0x96   :  { %394 = vmatpush1.bf16.msra.mxu0 %v1372_v13  ;;  %v1420_v13 = vld [vmem:[%s2060_s9 + $0x68] sm:$0xff]  }
  0x97   :  { %395 = vmatprep.subr.bf16.mxu0 %v1620_v0 }
  0x9a   :  { %396 = vmatpush1.bf16.msra.mxu0 %v1373_v14  ;;  %v1421_v14 = vld [vmem:[%s2060_s9 + $0x88] sm:$0xff]  }
  0x9b   :  { %397 = vmatprep.subr.bf16.mxu0 %v1620_v0 }
  0x9e   :  { %398 = vmatpush1.bf16.msra.mxu0 %v1374_v15  ;;  %v1422_v15 = vld [vmem:[%s2060_s9 + $0x28] sm:$0xff]  }
  0x9f   :  { %399 = vmatprep.subr.bf16.mxu0 %v1620_v0 }
  0xa2   :  { %400 = vmatpush1.bf16.msra.mxu0 %v1375_v16  ;;  %v1423_v16 = vld [vmem:[%s2060_s9 + $0xd0] sm:$0xff]  }
  0xa3   :  { %401 = vmatprep.subr.bf16.mxu0 %v1620_v0 }
  0xa6   :  { %402 = vmatpush1.bf16.msra.mxu0 %v1376_v17  ;;  %v1424_v17 = vld [vmem:[%s2060_s9 + $0x70] sm:$0xff]  }
  0xa7   :  { %403 = vmatprep.subr.bf16.mxu0 %v1620_v0 }
  0xaa   :  { %404 = vmatpush1.bf16.msra.mxu0 %v1377_v18  ;;  %v1425_v18 = vld [vmem:[%s2060_s9 + $0x90] sm:$0xff]  }
  0xab   :  { %405 = vmatprep.subr.bf16.mxu0 %v1620_v0 }
  0xae   :  { %406 = vmatpush1.bf16.msra.mxu0 %v1378_v19  ;;  %v1426_v19 = vld [vmem:[%s2060_s9 + $0x30] sm:$0xff]  }
  0xaf   :  { %407 = vmatprep.subr.bf16.mxu0 %v1620_v0 }
  0xb2   :  { %408 = vmatpush1.bf16.msra.mxu0 %v1379_v20  ;;  %v1427_v20 = vld [vmem:[%s2060_s9 + $0xd8] sm:$0xff]  }
  0xb3   :  { %409 = vmatprep.subr.bf16.mxu0 %v1620_v0 }
  0xb6   :  { %410 = vmatpush1.bf16.msra.mxu0 %v1380_v21  ;;  %v1428_v21 = vld [vmem:[%s2060_s9 + $0x78] sm:$0xff]  }
  0xb7   :  { %411 = vmatprep.subr.bf16.mxu0 %v1620_v0 }
  0xba   :  { %412 = vmatpush1.bf16.msra.mxu0 %v1384_v22  ;;  %v1429_v22 = vld [vmem:[%s2060_s9 + $0x98] sm:$0xff]  }
  0xbb   :  { %413 = vmatprep.subr.bf16.mxu0 %v1620_v0 }
  0xbe   :  { %414 = vmatpush1.bf16.msra.mxu0 %v1388_v25  ;;  %v1432_v25 = vld [vmem:[%s2060_s9 + $0xa0] sm:$0xff]  }
  0xbf   :  { %1281 = vmatprep.subr.bf16.mxu0 %v1415_v31  ;;  %v1438_v31 = vld [vmem:[%s2060_s9 + $0xb8] sm:$0xff]  }
 0x15c   :  { %v209_v39 = vpop.f32.mrb[0].mxu0 }
 0x15d   :  { %v210_v40 = vadd.f32 %v209_v39, %v144_v37  ;;  %v211_v41 = vpop.f32.mrb[1].mxu0 }
 0x15e   :  { %v212_v42 = vadd.f32 %v211_v41, %v148_v38  ;;  %v213_v43 = vpop.f32.mrb[2].mxu0  ;;  %v458_v41 = vrot.slane %v449_v35, %v147_v36 }
 0x15f   :  { %v216_v44 = vmax.f32 %v210_v40, 0.0  ;;  %v214_v45 = vpop.f32.mrb[3].mxu0  ;;  %v454_v40 = vrot.slane %v449_v35, %v143_v34 }
 0x160   :  { %v217_v46 = vmax.f32 %v212_v42, 0.0 }
 0x161   :  { %v282_v50 = vpack.c.bf16 %v216_v44, %v216_v44 }
 0x162   :  { %v283_v47 = vpack.c.bf16 %v217_v46, %v217_v46 }
 0x164   :  { %v275_v51 = vpop.f32.mrb[4].mxu0  ;;  %1192 = vmatprep.mubr.msk.bf16.mxu0 %vm387_vm2, %v283_v47 }
 0x165   :  { %v276_v52 = vadd.f32 %v1175_v48, %v275_v51  ;;  %v1321_v53 = vpop.f32.mrb[5].mxu0  ;;  %424 = vmatmul.mubr.bf16.vlgmr.msra.gmra.mrb[8].mxu0 %v282_v50 }
 0x166   :  { %v278_v54 = vpop.f32.mrb[6].mxu0  ;;  %1282 = vmatpush3.bf16.msra.mxu0 %v1417_v49  ;;  %v465_v53 = vsub.s32 3, %v1889_v33 }
 0x167   :  { %v281_v55 = vmax.f32 %v276_v52, 0.0  ;;  %v1322_v56 = vpop.f32.mrb[7].mxu0  ;;  %1283 = vmatprep.subr.bf16.mxu0 %v1419_v12  ;;  %v461_v52 = vsub.s32 2, %v1889_v33  ;;  %v1439_v33 = vld [vmem:[%s2063_s12] sm:$0xff]  }
 0x168   :  { %v466_v36 = vrot.slane %v449_v35, %v465_v53 }
 0x169   :  { %v432_v58 = vpack.c.bf16 %v281_v55, %v281_v55  ;;  %v462_v34 = vrot.slane %v449_v35, %v461_v52 }
 0x16a   :  { %1284 = vmatpush3.bf16.msra.mxu0 %v1421_v14 }
 0x16b   :  { %1209 = vmatmul.mubr.msk.bf16.vlgmr.msra.gmra.mrb[0].mxu1 %vm387_vm2, %v432_v58  ;;  %1285 = vmatprep.subr.bf16.mxu0 %v1423_v16  ;;  %v1441_v16 = vld [vmem:[#allocation10] sm:$0xff]  }
 0x16c   :  { %596 = vmatpush1.bf16.msra.mxu1 %v1395_v57  ;;  %627 = vmatprep.mubr.bf16.mxu1 %v1620_v0  ;;  %v1404_v0 = vld [vmem:[%s2058_s7 + $0x68] ss:$16 sps:$4 sm:$0xff]  }
 0x16d   :  { %597 = vmatprep.subr.bf16.mxu1 %v1400_v59 }
 0x16e   :  { %1286 = vmatpush3.bf16.msra.mxu0 %v1425_v18  ;;  %v1442_v18 = vld [vmem:[#allocation10 + $0x8] sm:$0xff]  }
 0x16f   :  { %1287 = vmatprep.subr.bf16.mxu0 %v1427_v20  ;;  %v1444_v20 = vld [vmem:[#allocation10 + $0x18] sm:$0xff]  }
 0x170   :  { %598 = vmatpush1.bf16.msra.mxu1 %v1398_v60 }
 0x171   :  { %599 = vmatprep.subr.bf16.mxu1 %v1403_v61 }
 0x172   :  { %1288 = vmatpush3.bf16.msra.mxu0 %v1429_v22  ;;  %v1446_v22 = vld [vmem:[#allocation10 + $0x28] sm:$0xff]  }
 0x173   :  { %1289 = vmatprep.subr.bf16.mxu0 %v1431_v24  ;;  %v1447_v24 = vld [vmem:[#allocation10 + $0x30] sm:$0xff]  }
 0x174   :  { %600 = vmatpush1.bf16.msra.mxu1 %v1401_v62 }
 0x175   :  { %601 = vmatprep.subr.bf16.mxu1 %v1406_v63 }
 0x176   :  { %1290 = vmatpush3.bf16.msra.mxu0 %v1432_v25 }
 0x177   :  { %1291 = vmatprep.subr.bf16.mxu0 %v1433_v26  ;;  %v1448_v26 = vld [vmem:[#allocation10 + $0x38] sm:$0xff]  }
 0x178   :  { %602 = vmatpush1.bf16.msra.mxu1 %v1404_v0  ;;  %v1440_v0 = vld [vmem:[%s2063_s12 + $0x8] sm:$0xff]  }
 0x179   :  { %1259 = vmatprep.subr.bf16.mxu1 %v1407_v1 }
 0x17a   :  { %1292 = vmatpush3.bf16.msra.mxu0 %v1434_v27 }
 0x17b   :  { %1210 = vmatmul.mubr.msk.bf16.vlgmr.msra.gmra.mrb[4].mxu1 %vm387_vm2, %v432_v58  ;;  %1293 = vmatprep.subr.bf16.mxu0 %v1435_v28 }
 0x17c   :  { %1260 = vmatpush3.bf16.msra.mxu1 %v1408_v2 }
 0x17d   :  { %1261 = vmatprep.subr.bf16.mxu1 %v1409_v3 }
 0x17e   :  { %1294 = vmatpush3.bf16.msra.mxu0 %v1436_v29 }
 0x17f   :  { %1295 = vmatprep.subr.bf16.mxu0 %v1437_v30 }
 0x180   :  { %1262 = vmatpush3.bf16.msra.mxu1 %v1410_v4 }
 0x181   :  { %1263 = vmatprep.subr.bf16.mxu1 %v1411_v5 }
 0x182   :  { %1296 = vmatpush3.bf16.msra.mxu0 %v1438_v31 }
 0x184   :  { %1264 = vmatpush3.bf16.msra.mxu1 %v1412_v6  ;;  %v1211_v6 = vld [vmem:[#allocation9] ss:$0 sm:$0xff] }
 0x185   :  { %1265 = vmatprep.subr.bf16.mxu1 %v1413_v7 }
 0x188   :  { %1266 = vmatpush3.bf16.msra.mxu1 %v1414_v9 }
 0x189   :  { %1267 = vmatprep.subr.bf16.mxu1 %v1416_v10 }
 0x18c   :  { %1268 = vmatpush3.bf16.msra.mxu1 %v1418_v11 }
 0x18d   :  { %1269 = vmatprep.subr.bf16.mxu1 %v1420_v13 }
 0x190   :  { %1270 = vmatpush3.bf16.msra.mxu1 %v1422_v15 }
 0x191   :  { %1271 = vmatprep.subr.bf16.mxu1 %v1424_v17 }
 0x194   :  { %1272 = vmatpush3.bf16.msra.mxu1 %v1426_v19  ;;  %v1443_v19 = vld [vmem:[#allocation10 + $0x10] sm:$0xff]  }
 0x195   :  { %1273 = vmatprep.subr.bf16.mxu1 %v1428_v21  ;;  %v1445_v21 = vld [vmem:[#allocation10 + $0x20] sm:$0xff]  }
 0x198   :  { %1274 = vmatpush3.bf16.msra.mxu1 %v1430_v23  ;;  %v1179_v23 = vld [vmem:[#allocation7] ss:$0 sm:$0xff] }
 0x199   :  { %1323 = vmatprep.subr.bf16.mxu1 %v1621_v8 }
 0x238   :  { %v2016_v32 = vpop.f32.mrb[8].mxu0 }
 0x239   :  { %v427_v37 = vpop.f32.mrb[9].mxu0  ;;  %v426_v25 = vadd.f32 %v1179_v23, %v2016_v32 }
 0x23a   :  { %v428_v38 = vpop.f32.mrb[10].mxu0 }
 0x23b   :  { %v429_v39 = vpop.f32.mrb[11].mxu0  ;;  %v431_v27 = vmax.f32 %v426_v25, 0.0  ;;  %v1255_v38 = vld [vmem:[#allocation12] ss:$0 sm:$0xff] }
 0x23d   :  { %v988_v28 = vpack.c.bf16 %v431_v27, %v431_v27 }
 0x23e   :  { %v588_v42 = vpop.f32.mrb[0].mxu1 }
 0x23f   :  { %v589_v43 = vadd.f32 %v588_v42, %v454_v40  ;;  %v590_v44 = vpop.f32.mrb[1].mxu1 }
 0x240   :  { %v591_v45 = vadd.f32 %v590_v44, %v458_v41  ;;  %v592_v46 = vpop.f32.mrb[2].mxu1 }
 0x241   :  { %v636_v47 = vmax.f32 %v589_v43, 0.0  ;;  %v593_v48 = vpop.f32.mrb[3].mxu1 }
 0x242   :  { %v637_v49 = vmax.f32 %v591_v45, 0.0 }
 0x243   :  { %v640_v51 = vpack.c.bf16 %v636_v47, %v636_v47 }
 0x244   :  { %v641_v50 = vpack.c.bf16 %v637_v49, %v637_v49 }
 0x246   :  { %939 = vmatprep.mubr.bf16.mxu1 %v641_v50 }
 0x247   :  { %940 = vmatmul.mubr.bf16.vlgmr.msra.gmra.mrb[8].mxu1 %v640_v51 }
 0x248   :  { %1327 = vmatprep.mubr.msk.bf16.mxu1 %vm1622_vm1, %v1621_v8  ;;  %1324 = vmatpush3.bf16.msra.mxu1 %v1439_v33 }
 0x249   :  { %1325 = vmatprep.subr.bf16.mxu1 %v1621_v8 }
 0x24c   :  { %1326 = vmatpush3.bf16.msra.mxu1 %v1440_v0 }
 0x24d   :  { %1331 = vmatprep.subr.bf16.mxu1 %v1621_v8 }
 0x24e   :  { %v629_v54 = vpop.f32.mrb[4].mxu1 }
 0x24f   :  { %v630_v55 = vadd.f32 %v629_v54, %v462_v34  ;;  %v631_v56 = vpop.f32.mrb[5].mxu1 }
 0x250   :  { %v632_v57 = vadd.f32 %v631_v56, %v466_v36  ;;  %v633_v58 = vpop.f32.mrb[6].mxu1 }
 0x251   :  { %v638_v59 = vmax.f32 %v630_v55, 0.0  ;;  %v634_v60 = vpop.f32.mrb[7].mxu1 }
 0x252   :  { %v639_v61 = vmax.f32 %v632_v57, 0.0 }
 0x253   :  { %v642_v63 = vpack.c.bf16 %v638_v59, %v638_v59 }
 0x254   :  { %v643_v62 = vpack.c.bf16 %v639_v61, %v639_v61 }
 0x256   :  { %979 = vmatprep.mubr.bf16.mxu0 %v643_v62 }
 0x257   :  { %980 = vmatmul.mubr.bf16.vlgmr.msra.gmra.mrb[12].mxu0 %v642_v63 }
 0x31a   :  { %v1275_v1 = vpop.f32.mrb[8].mxu1 }
 0x31b   :  { %v1276_v2 = vpop.f32.mrb[9].mxu1 }
 0x31c   :  { %v1277_v3 = vadd.f32 %v1276_v2, %v1275_v1  ;;  %v1278_v4 = vpop.f32.mrb[10].mxu1 }
 0x31d   :  { %v1279_v5 = vpop.f32.mrb[11].mxu1 }
 0x31e   :  { %v942_v10 = vadd.f32 %v1277_v3, %v1211_v6 }
 0x32a   :  { %v1297_v7 = vpop.f32.mrb[12].mxu0 }
 0x32b   :  { %v1298_v9 = vpop.f32.mrb[13].mxu0 }
 0x32c   :  { %v1299_v11 = vadd.f32 %v1298_v9, %v1297_v7  ;;  %v1300_v12 = vpop.f32.mrb[14].mxu0 }
 0x32d   :  { %v1301_v13 = vpop.f32.mrb[15].mxu0 }
 0x32e   :  { %v982_v14 = vadd.f32 %v1299_v11, %v942_v10 }
 0x330   :  { %v987_v15 = vmax.f32 %v982_v14, 0.0 }
 0x332   :  { %v1005_v17 = vpack.c.bf16 %v987_v15, %v987_v15 }
 0x334   :  { %1328 = vmatmul.mubr.msk.bf16.vlgmr.msra.gmra.mrb[12].mxu1 %vm171_vm0, %v1005_v17 }
 0x335   :  { %1332 = vmatpush3.bf16.msra.mxu1 %v1441_v16  ;;  %1347 = vmatprep.mubr.msk.bf16.mxu1 %vm1622_vm1, %v1621_v8 }
 0x336   :  { %1333 = vmatprep.subr.bf16.mxu1 %v1621_v8 }
 0x339   :  { %1334 = vmatpush3.bf16.msra.mxu1 %v1442_v18 }
 0x33a   :  { %1335 = vmatprep.subr.bf16.mxu1 %v1621_v8 }
 0x33d   :  { %1336 = vmatpush3.bf16.msra.mxu1 %v1443_v19 }
 0x33e   :  { %1337 = vmatprep.subr.bf16.mxu1 %v1621_v8 }
 0x341   :  { %1338 = vmatpush3.bf16.msra.mxu1 %v1444_v20 }
 0x342   :  { %1339 = vmatprep.subr.bf16.mxu1 %v1621_v8 }
 0x345   :  { %1340 = vmatpush3.bf16.msra.mxu1 %v1445_v21 }
 0x346   :  { %1341 = vmatprep.subr.bf16.mxu1 %v1621_v8 }
 0x349   :  { %1342 = vmatpush3.bf16.msra.mxu1 %v1446_v22 }
 0x34a   :  { %1343 = vmatprep.subr.bf16.mxu1 %v1621_v8 }
 0x34d   :  { %1344 = vmatpush3.bf16.msra.mxu1 %v1447_v24 }
 0x34e   :  { %1345 = vmatprep.subr.bf16.mxu1 %v1621_v8 }
 0x351   :  { %1346 = vmatpush3.bf16.msra.mxu1 %v1448_v26 }
 0x354   :  { %1348 = vmatmul.mubr.bf16.vlgmr.msra.gmra.mrb[16].mxu1 %v988_v28 }
 0x407   :  { %v1059_v29 = vpop.f32.mrb[12].mxu1 }
 0x408   :  { %v1329_v30 = vpop.f32.mrb[13].mxu1 }
 0x409   :  { %v1062_v31 = vpop.f32.mrb[14].mxu1 }
 0x40a   :  { %v1330_v35 = vpop.f32.mrb[15].mxu1 }
 0x427   :  { %v1147_v37 = vpop.f32.mrb[16].mxu1 }
 0x428   :  { %v1148_v39 = vadd.f32 %v1147_v37, %v1059_v29  ;;  %v1349_v40 = vpop.f32.mrb[17].mxu1 }
 0x429   :  { %v1150_v41 = vpop.f32.mrb[18].mxu1 }
 0x42a   :  { %v1160_v32 = vadd.f32 %v1255_v38, %v1148_v39  ;;  %v1350_v42 = vpop.f32.mrb[19].mxu1 }
 0x42c   :  { %1161 = vst [vmem:[%s2065_s14] sm:$0xff] %v1160_v32 }
 0x42d   :  { %1166 = vsyncpa [#allocation3], 1 }
 0x42e   :  { %1167 = vsyncpa [#allocation5], 1 }
 0x42f   :  { %1168 = vsyncpa [#allocation8], 1 }
 0x430   :  { %1169 = vsyncpa [#allocation11], 1 }

</bundles_post_ra>
